<compile_context>
chip_gen: v6e
topology: v6e:2x2x1
jax: 0.10.0
libtpu: 0.0.40
codegen_flags: <defaults>
</compile_context>

<pallas_src>
import math

import jax
import jax.numpy as jnp
from jax.experimental import pallas as pl
from jax.experimental.pallas import tpu as pltpu


def fusion_kernel(t_ref, a_ref,
                  wt_ref, bt_ref, wa_ref, ba_ref,
                  wqkv_ref, bqkv_ref,
                  seg_ref, segT_ref,
                  wo_ref, bo_ref,
                  wr_ref, br_ref,
                  wout_ref, bout_ref,
                  out_ref):
    f32 = jnp.float32
    bf16 = jnp.bfloat16

    TB, D = t_ref.shape

    def mm(x, w_ref):
        # bf16 operands on the MXU, f32 accumulation.
        return jnp.dot(x.astype(bf16), w_ref[...], preferred_element_type=f32)

    # ---- text / audio projections ------------------------------------------
    tp = mm(t_ref[...], wt_ref) + bt_ref[...]              # (TB, D) f32
    ap = mm(a_ref[...], wa_ref) + ba_ref[...]              # (TB, D) f32

    # ---- fused QKV in-projection for both "tokens" (seq_len == 2) ----------
    # (1/sqrt(head_dim) query scale pre-folded into the Q columns host-side)
    x2 = jnp.concatenate([tp, ap], axis=0)                 # (2*TB, D)
    qkv = mm(x2, wqkv_ref) + bqkv_ref[...]                 # (2*TB, 3D)
    qt, kt, vt = qkv[:TB, 0:D], qkv[:TB, D:2 * D], qkv[:TB, 2 * D:3 * D]
    qa, ka, va = qkv[TB:, 0:D], qkv[TB:, D:2 * D], qkv[TB:, 2 * D:3 * D]

    # ---- per-head scores: one (4*TB, D) x (D, H) segment-sum matmul ---------
    qk_stack = jnp.concatenate([qt * kt, qt * ka, qa * kt, qa * ka], axis=0)
    scores = jnp.dot(qk_stack.astype(bf16), seg_ref[...],
                     preferred_element_type=f32)           # (4*TB, H)
    s_tt, s_ta = scores[0 * TB:1 * TB], scores[1 * TB:2 * TB]
    s_at, s_aa = scores[2 * TB:3 * TB], scores[3 * TB:4 * TB]

    def two_way_softmax(s0, s1):
        m = jnp.maximum(s0, s1)
        e0 = jnp.exp(s0 - m)
        e1 = jnp.exp(s1 - m)
        inv = pl.reciprocal(e0 + e1, approx=True)          # EUP slot
        return e0 * inv, e1 * inv

    w_tt, w_ta = two_way_softmax(s_tt, s_ta)               # query = text token
    w_at, w_aa = two_way_softmax(s_at, s_aa)               # query = audio token

    # Only the token-mean is consumed downstream -> sum the attention weights
    # over the two query tokens BEFORE broadcasting over head_dim.
    u = jnp.concatenate([w_tt + w_at, w_ta + w_aa], axis=0)   # (2*TB, H)
    ub = jnp.dot(u.astype(bf16), segT_ref[...],
                 preferred_element_type=f32)                  # (2*TB, D)
    att_mean = 0.5 * (ub[:TB] * vt + ub[TB:] * va)            # (TB, D)

    # out_proj applied once to the averaged pre-projection tensor, then mean
    # over the 2 tokens is already folded in; residual layer follows.
    fused = mm(att_mean, wo_ref) + bo_ref[...]                # (TB, D)
    residual = mm(fused, wr_ref) + br_ref[...] + fused

    # ---- output_layer (D -> 1): VPU multiply + lane reduce (no MXU push) ----
    out_col = (jnp.sum(residual * wout_ref[...], axis=-1, keepdims=True)
               + bout_ref[...])                               # (TB, 1)
    # lane-dense output slab; wrapper keeps column 0
    out_ref[...] = jnp.broadcast_to(out_col, out_ref.shape).astype(out_ref.dtype)


def _pick_block_b(B):
    """Largest power-of-two tile <= 256 dividing B; prefer grid extent >= 2
    so the 'parallel' axis can shard across TensorCores."""
    best = None
    for bb in (256, 128, 64, 32, 16, 8):
        if B % bb == 0:
            if best is None:
                best = bb
            if B // bb >= 2:
                return bb
    return best if best is not None else B


def advanced_fusion(text_embeds, audio_embeds, params, *, num_heads=8,
                    block_b=None):
    B, D = text_embeds.shape
    assert audio_embeds.shape == (B, D)
    assert D % num_heads == 0
    head_dim = D // num_heads
    if block_b is None:
        block_b = _pick_block_b(B)
    assert B % block_b == 0

    f32, bf16 = jnp.float32, jnp.bfloat16
    scale = 1.0 / math.sqrt(head_dim)

    # Weights pre-transposed to (in, out); matmul operands bf16, biases f32.
    # Query scale folded into Wq / bq (exact reassociation of the MHA math).
    wqkv = jnp.concatenate([params["wq"] * scale, params["wk"], params["wv"]],
                           axis=1).astype(bf16)            # (D, 3D)
    bqkv = jnp.concatenate([params["bq"] * scale, params["bk"], params["bv"]],
                           axis=1).astype(f32)             # (1, 3D)

    # Constant one-hot head-membership matrices (constant index_map -> fetched
    # once and kept resident; avoids per-step iota/compare construction).
    head_of = jnp.arange(D, dtype=jnp.int32) // head_dim
    heads = jnp.arange(num_heads, dtype=jnp.int32)
    seg = (head_of[:, None] == heads[None, :]).astype(bf16)     # (D, H)
    segT = (heads[:, None] == head_of[None, :]).astype(bf16)    # (H, D)

    weight_args = [
        params["wt"].astype(bf16), params["bt"].astype(f32),
        params["wa"].astype(bf16), params["ba"].astype(f32),
        wqkv, bqkv,
        seg, segT,
        params["wo"].astype(bf16), params["bo"].astype(f32),
        params["wr"].astype(bf16), params["br"].astype(f32),
        params["wout"].astype(f32), params["bout"].astype(f32),
    ]

    def full_spec(arr):
        nd = arr.ndim
        return pl.BlockSpec(arr.shape, lambda i, _nd=nd: (0,) * _nd)

    in_specs = [
        pl.BlockSpec((block_b, D), lambda i: (i, 0)),
        pl.BlockSpec((block_b, D), lambda i: (i, 0)),
    ] + [full_spec(a) for a in weight_args]

    OUT_LANES = 128   # lane-dense output (avoids masked partial stores)
    out = pl.pallas_call(
        fusion_kernel,
        out_shape=jax.ShapeDtypeStruct((B, OUT_LANES), jnp.float32),
        grid_spec=pltpu.PrefetchScalarGridSpec(
            num_scalar_prefetch=0,
            grid=(B // block_b,),
            in_specs=in_specs,
            out_specs=pl.BlockSpec((block_b, OUT_LANES), lambda i: (i, 0)),
        ),
        compiler_params=pltpu.CompilerParams(
            dimension_semantics=("parallel",)),
    )(text_embeds, audio_embeds, *weight_args)
    return out[:, :1]


def init_params(key, D):
    """Deterministic synthetic parameters matching ResidualAttentionFusion."""
    ks = jax.random.split(key, 16)
    s = 1.0 / math.sqrt(D)

    def w(k, shape):
        return jax.random.normal(k, shape, jnp.float32) * s

    return dict(
        # text_proj / audio_proj (Linear(D, D)), stored transposed (in, out)
        wt=w(ks[0], (D, D)), bt=w(ks[1], (1, D)),
        wa=w(ks[2], (D, D)), ba=w(ks[3], (1, D)),
        # MultiheadAttention in_proj (splits of the (3D, D) in_proj_weight)
        wq=w(ks[4], (D, D)), bq=w(ks[5], (1, D)),
        wk=w(ks[6], (D, D)), bk=w(ks[7], (1, D)),
        wv=w(ks[8], (D, D)), bv=w(ks[9], (1, D)),
        # MultiheadAttention out_proj
        wo=w(ks[10], (D, D)), bo=w(ks[11], (1, D)),
        # residual_layer
        wr=w(ks[12], (D, D)), br=w(ks[13], (1, D)),
        # output_layer (Linear(D, 1)); weight stored as a row vector
        wout=w(ks[14], (1, D)), bout=w(ks[15], (1, 1)),
    )


def fusion_reference(text_embeds, audio_embeds, params, *, num_heads=8):
    """Pure-JAX reference of ResidualAttentionFusion (bf16 matmul operands to
    roughly match kernel numerics; otherwise the faithful per-token math)."""
    f32, bf16 = jnp.float32, jnp.bfloat16

    def lin(x, w, b):
        return jnp.dot(x.astype(bf16), w.astype(bf16),
                       preferred_element_type=f32) + b

    tp = lin(text_embeds, params["wt"], params["bt"])
    ap = lin(audio_embeds, params["wa"], params["ba"])
    x = jnp.stack([tp, ap], axis=0)                       # (2, B, D)
    B, D = tp.shape
    hd = D // num_heads

    def proj(w, b):
        return lin(x.reshape(2 * B, D), w, b).reshape(2, B, num_heads, hd)

    q = proj(params["wq"], params["bq"])
    k = proj(params["wk"], params["bk"])
    v = proj(params["wv"], params["bv"])
    s = jnp.einsum("sbhd,tbhd->bhst", q, k) / math.sqrt(hd)
    p = jax.nn.softmax(s, axis=-1)
    att = jnp.einsum("bhst,tbhd->sbhd", p, v).reshape(2, B, D)
    attd = lin(att.reshape(2 * B, D), params["wo"],
               params["bo"]).reshape(2, B, D)
    fused = attd.mean(axis=0)
    residual = lin(fused, params["wr"], params["br"]) + fused
    return (jnp.sum(residual * params["wout"], axis=-1, keepdims=True)
            + params["bout"])


if __name__ == "__main__":
    B = 16         # small demo batch; _pick_block_b -> 8, grid (2,)
    D = 128        # fusion_dim stand-in (real model uses 512); head_dim = 16
    H = 8

    key = jax.random.PRNGKey(0)
    k_t, k_a, k_p = jax.random.split(key, 3)

    # stand-ins for BertModel / Wav2Vec2Model first-token (CLS) embeddings
    text_embeds = jax.random.normal(k_t, (B, D), jnp.float32)
    audio_embeds = jax.random.normal(k_a, (B, D), jnp.float32)
    params = init_params(k_p, D)

    logits = advanced_fusion(text_embeds, audio_embeds, params, num_heads=H)
    logits = jax.block_until_ready(logits)
    assert logits.shape == (B, 1) and logits.dtype == jnp.float32

    ref = fusion_reference(text_embeds, audio_embeds, params, num_heads=H)
    max_err = float(jnp.max(jnp.abs(logits - ref)))
    assert jnp.allclose(logits, ref, atol=1e-1, rtol=1e-1), max_err

    print("KERNEL_OK")
</pallas_src>

<mosaic_0001>
module attributes {stable_mosaic.version = 11 : i64} {
  func.func @fusion_kernel(%arg0: i32, %arg1: memref<8x128xf32, #tpu.memory_space<vmem>>, %arg2: memref<8x128xf32, #tpu.memory_space<vmem>>, %arg3: memref<128x128xbf16, #tpu.memory_space<vmem>>, %arg4: memref<1x128xf32, #tpu.memory_space<vmem>>, %arg5: memref<128x128xbf16, #tpu.memory_space<vmem>>, %arg6: memref<1x128xf32, #tpu.memory_space<vmem>>, %arg7: memref<128x384xbf16, #tpu.memory_space<vmem>>, %arg8: memref<1x384xf32, #tpu.memory_space<vmem>>, %arg9: memref<128x8xbf16, #tpu.memory_space<vmem>>, %arg10: memref<8x128xbf16, #tpu.memory_space<vmem>>, %arg11: memref<128x128xbf16, #tpu.memory_space<vmem>>, %arg12: memref<1x128xf32, #tpu.memory_space<vmem>>, %arg13: memref<128x128xbf16, #tpu.memory_space<vmem>>, %arg14: memref<1x128xf32, #tpu.memory_space<vmem>>, %arg15: memref<1x128xf32, #tpu.memory_space<vmem>>, %arg16: memref<1x1xf32, #tpu.memory_space<vmem>>, %arg17: memref<8x128xf32, #tpu.memory_space<vmem>>) attributes {dimension_semantics = [#tpu.dimension_semantics<parallel>], iteration_bounds = array<i64: 2>, scalar_prefetch = 0 : i64, scratch_operands = 0 : i64, tpu.core_type = #tpu.core_type<tc>, window_params = [{transform_indices = @transform_0, window_bounds = array<i64: 8, 128>}, {transform_indices = @transform_1, window_bounds = array<i64: 8, 128>}, {pipeline_mode = #tpu.pipeline_mode<synchronous>, transform_indices = @transform_2, window_bounds = array<i64: 128, 128>}, {pipeline_mode = #tpu.pipeline_mode<synchronous>, transform_indices = @transform_3, window_bounds = array<i64: 1, 128>}, {pipeline_mode = #tpu.pipeline_mode<synchronous>, transform_indices = @transform_4, window_bounds = array<i64: 128, 128>}, {pipeline_mode = #tpu.pipeline_mode<synchronous>, transform_indices = @transform_5, window_bounds = array<i64: 1, 128>}, {pipeline_mode = #tpu.pipeline_mode<synchronous>, transform_indices = @transform_6, window_bounds = array<i64: 128, 384>}, {pipeline_mode = #tpu.pipeline_mode<synchronous>, transform_indices = @transform_7, window_bounds = array<i64: 1, 384>}, {pipeline_mode = #tpu.pipeline_mode<synchronous>, transform_indices = @transform_8, window_bounds = array<i64: 128, 8>}, {pipeline_mode = #tpu.pipeline_mode<synchronous>, transform_indices = @transform_9, window_bounds = array<i64: 8, 128>}, {pipeline_mode = #tpu.pipeline_mode<synchronous>, transform_indices = @transform_10, window_bounds = array<i64: 128, 128>}, {pipeline_mode = #tpu.pipeline_mode<synchronous>, transform_indices = @transform_11, window_bounds = array<i64: 1, 128>}, {pipeline_mode = #tpu.pipeline_mode<synchronous>, transform_indices = @transform_12, window_bounds = array<i64: 128, 128>}, {pipeline_mode = #tpu.pipeline_mode<synchronous>, transform_indices = @transform_13, window_bounds = array<i64: 1, 128>}, {pipeline_mode = #tpu.pipeline_mode<synchronous>, transform_indices = @transform_14, window_bounds = array<i64: 1, 128>}, {pipeline_mode = #tpu.pipeline_mode<synchronous>, transform_indices = @transform_15, window_bounds = array<i64: 1, 1>}, {transform_indices = @transform_16, window_bounds = array<i64: 8, 128>}]} {
    %c0 = arith.constant 0 : index
    %c0_0 = arith.constant 0 : index
    %0 = vector.load %arg1[%c0, %c0_0] : memref<8x128xf32, #tpu.memory_space<vmem>>, vector<8x128xf32>
    %1 = arith.truncf %0 : vector<8x128xf32> to vector<8x128xbf16>
    %c0_1 = arith.constant 0 : index
    %c0_2 = arith.constant 0 : index
    %2 = vector.load %arg3[%c0_1, %c0_2] : memref<128x128xbf16, #tpu.memory_space<vmem>>, vector<128x128xbf16>
    %cst = arith.constant dense<0.000000e+00> : vector<8x128xf32>
    %3 = tpu.matmul %1, %2, %cst {dimension_numbers = #tpu.dot_dimension_numbers<[1], [0], [0], [1], [0, 0, 1, 1], [], []>} : vector<8x128xbf16>, vector<128x128xbf16>, vector<8x128xf32> -> vector<8x128xf32>
    %c0_3 = arith.constant 0 : index
    %c0_4 = arith.constant 0 : index
    %4 = vector.load %arg4[%c0_3, %c0_4] : memref<1x128xf32, #tpu.memory_space<vmem>>, vector<1x128xf32>
    %5 = vector.broadcast %4 : vector<1x128xf32> to vector<8x128xf32>
    %6 = arith.addf %3, %5 : vector<8x128xf32>
    %c0_5 = arith.constant 0 : index
    %c0_6 = arith.constant 0 : index
    %7 = vector.load %arg2[%c0_5, %c0_6] : memref<8x128xf32, #tpu.memory_space<vmem>>, vector<8x128xf32>
    %8 = arith.truncf %7 : vector<8x128xf32> to vector<8x128xbf16>
    %c0_7 = arith.constant 0 : index
    %c0_8 = arith.constant 0 : index
    %9 = vector.load %arg5[%c0_7, %c0_8] : memref<128x128xbf16, #tpu.memory_space<vmem>>, vector<128x128xbf16>
    %cst_9 = arith.constant dense<0.000000e+00> : vector<8x128xf32>
    %10 = tpu.matmul %8, %9, %cst_9 {dimension_numbers = #tpu.dot_dimension_numbers<[1], [0], [0], [1], [0, 0, 1, 1], [], []>} : vector<8x128xbf16>, vector<128x128xbf16>, vector<8x128xf32> -> vector<8x128xf32>
    %c0_10 = arith.constant 0 : index
    %c0_11 = arith.constant 0 : index
    %11 = vector.load %arg6[%c0_10, %c0_11] : memref<1x128xf32, #tpu.memory_space<vmem>>, vector<1x128xf32>
    %12 = vector.broadcast %11 : vector<1x128xf32> to vector<8x128xf32>
    %13 = arith.addf %10, %12 : vector<8x128xf32>
    %14 = tpu.concatenate %6, %13 in 0 : vector<8x128xf32>, vector<8x128xf32> -> vector<16x128xf32>
    %15 = arith.truncf %14 : vector<16x128xf32> to vector<16x128xbf16>
    %c0_12 = arith.constant 0 : index
    %c0_13 = arith.constant 0 : index
    %16 = vector.load %arg7[%c0_12, %c0_13] : memref<128x384xbf16, #tpu.memory_space<vmem>>, vector<128x384xbf16>
    %cst_14 = arith.constant dense<0.000000e+00> : vector<16x384xf32>
    %17 = tpu.matmul %15, %16, %cst_14 {dimension_numbers = #tpu.dot_dimension_numbers<[1], [0], [0], [1], [0, 0, 1, 1], [], []>} : vector<16x128xbf16>, vector<128x384xbf16>, vector<16x384xf32> -> vector<16x384xf32>
    %c0_15 = arith.constant 0 : index
    %c0_16 = arith.constant 0 : index
    %18 = vector.load %arg8[%c0_15, %c0_16] : memref<1x384xf32, #tpu.memory_space<vmem>>, vector<1x384xf32>
    %19 = vector.broadcast %18 : vector<1x384xf32> to vector<16x384xf32>
    %20 = arith.addf %17, %19 : vector<16x384xf32>
    %21 = vector.extract_strided_slice %20 {offsets = [0, 0], sizes = [8, 128], strides = [1, 1]} : vector<16x384xf32> to vector<8x128xf32>
    %22 = vector.extract_strided_slice %20 {offsets = [0, 128], sizes = [8, 128], strides = [1, 1]} : vector<16x384xf32> to vector<8x128xf32>
    %23 = vector.extract_strided_slice %20 {offsets = [0, 256], sizes = [8, 128], strides = [1, 1]} : vector<16x384xf32> to vector<8x128xf32>
    %24 = vector.extract_strided_slice %20 {offsets = [8, 0], sizes = [8, 128], strides = [1, 1]} : vector<16x384xf32> to vector<8x128xf32>
    %25 = vector.extract_strided_slice %20 {offsets = [8, 128], sizes = [8, 128], strides = [1, 1]} : vector<16x384xf32> to vector<8x128xf32>
    %26 = vector.extract_strided_slice %20 {offsets = [8, 256], sizes = [8, 128], strides = [1, 1]} : vector<16x384xf32> to vector<8x128xf32>
    %27 = arith.mulf %21, %22 : vector<8x128xf32>
    %28 = arith.mulf %21, %25 : vector<8x128xf32>
    %29 = arith.mulf %24, %22 : vector<8x128xf32>
    %30 = arith.mulf %24, %25 : vector<8x128xf32>
    %31 = tpu.concatenate %27, %28, %29, %30 in 0 : vector<8x128xf32>, vector<8x128xf32>, vector<8x128xf32>, vector<8x128xf32> -> vector<32x128xf32>
    %32 = arith.truncf %31 : vector<32x128xf32> to vector<32x128xbf16>
    %c0_17 = arith.constant 0 : index
    %c0_18 = arith.constant 0 : index
    %33 = vector.load %arg9[%c0_17, %c0_18] : memref<128x8xbf16, #tpu.memory_space<vmem>>, vector<128x8xbf16>
    %cst_19 = arith.constant dense<0.000000e+00> : vector<32x8xf32>
    %34 = tpu.matmul %32, %33, %cst_19 {dimension_numbers = #tpu.dot_dimension_numbers<[1], [0], [0], [1], [0, 0, 1, 1], [], []>} : vector<32x128xbf16>, vector<128x8xbf16>, vector<32x8xf32> -> vector<32x8xf32>
    %35 = vector.extract_strided_slice %34 {offsets = [0, 0], sizes = [8, 8], strides = [1, 1]} : vector<32x8xf32> to vector<8x8xf32>
    %36 = vector.extract_strided_slice %34 {offsets = [8, 0], sizes = [8, 8], strides = [1, 1]} : vector<32x8xf32> to vector<8x8xf32>
    %37 = vector.extract_strided_slice %34 {offsets = [16, 0], sizes = [8, 8], strides = [1, 1]} : vector<32x8xf32> to vector<8x8xf32>
    %38 = vector.extract_strided_slice %34 {offsets = [24, 0], sizes = [8, 8], strides = [1, 1]} : vector<32x8xf32> to vector<8x8xf32>
    %39 = arith.maximumf %35, %36 : vector<8x8xf32>
    %40 = arith.subf %35, %39 : vector<8x8xf32>
    %41 = math.exp %40 : vector<8x8xf32>
    %42 = arith.subf %36, %39 : vector<8x8xf32>
    %43 = math.exp %42 : vector<8x8xf32>
    %44 = arith.addf %41, %43 : vector<8x8xf32>
    %45 = tpu.reciprocal %44 {approx = true} : vector<8x8xf32> -> vector<8x8xf32>
    %46 = arith.mulf %41, %45 : vector<8x8xf32>
    %47 = arith.mulf %43, %45 : vector<8x8xf32>
    %48 = arith.maximumf %37, %38 : vector<8x8xf32>
    %49 = arith.subf %37, %48 : vector<8x8xf32>
    %50 = math.exp %49 : vector<8x8xf32>
    %51 = arith.subf %38, %48 : vector<8x8xf32>
    %52 = math.exp %51 : vector<8x8xf32>
    %53 = arith.addf %50, %52 : vector<8x8xf32>
    %54 = tpu.reciprocal %53 {approx = true} : vector<8x8xf32> -> vector<8x8xf32>
    %55 = arith.mulf %50, %54 : vector<8x8xf32>
    %56 = arith.mulf %52, %54 : vector<8x8xf32>
    %57 = arith.addf %46, %55 : vector<8x8xf32>
    %58 = arith.addf %47, %56 : vector<8x8xf32>
    %59 = tpu.concatenate %57, %58 in 0 : vector<8x8xf32>, vector<8x8xf32> -> vector<16x8xf32>
    %60 = arith.truncf %59 : vector<16x8xf32> to vector<16x8xbf16>
    %c0_20 = arith.constant 0 : index
    %c0_21 = arith.constant 0 : index
    %61 = vector.load %arg10[%c0_20, %c0_21] : memref<8x128xbf16, #tpu.memory_space<vmem>>, vector<8x128xbf16>
    %cst_22 = arith.constant dense<0.000000e+00> : vector<16x128xf32>
    %62 = tpu.matmul %60, %61, %cst_22 {dimension_numbers = #tpu.dot_dimension_numbers<[1], [0], [0], [1], [0, 0, 1, 1], [], []>} : vector<16x8xbf16>, vector<8x128xbf16>, vector<16x128xf32> -> vector<16x128xf32>
    %63 = vector.extract_strided_slice %62 {offsets = [0, 0], sizes = [8, 128], strides = [1, 1]} : vector<16x128xf32> to vector<8x128xf32>
    %64 = arith.mulf %63, %23 : vector<8x128xf32>
    %65 = vector.extract_strided_slice %62 {offsets = [8, 0], sizes = [8, 128], strides = [1, 1]} : vector<16x128xf32> to vector<8x128xf32>
    %66 = arith.mulf %65, %26 : vector<8x128xf32>
    %67 = arith.addf %64, %66 : vector<8x128xf32>
    %cst_23 = arith.constant 5.000000e-01 : f32
    %68 = vector.broadcast %cst_23 : f32 to vector<8x128xf32>
    %69 = arith.mulf %68, %67 : vector<8x128xf32>
    %70 = arith.truncf %69 : vector<8x128xf32> to vector<8x128xbf16>
    %c0_24 = arith.constant 0 : index
    %c0_25 = arith.constant 0 : index
    %71 = vector.load %arg11[%c0_24, %c0_25] : memref<128x128xbf16, #tpu.memory_space<vmem>>, vector<128x128xbf16>
    %cst_26 = arith.constant dense<0.000000e+00> : vector<8x128xf32>
    %72 = tpu.matmul %70, %71, %cst_26 {dimension_numbers = #tpu.dot_dimension_numbers<[1], [0], [0], [1], [0, 0, 1, 1], [], []>} : vector<8x128xbf16>, vector<128x128xbf16>, vector<8x128xf32> -> vector<8x128xf32>
    %c0_27 = arith.constant 0 : index
    %c0_28 = arith.constant 0 : index
    %73 = vector.load %arg12[%c0_27, %c0_28] : memref<1x128xf32, #tpu.memory_space<vmem>>, vector<1x128xf32>
    %74 = vector.broadcast %73 : vector<1x128xf32> to vector<8x128xf32>
    %75 = arith.addf %72, %74 : vector<8x128xf32>
    %76 = arith.truncf %75 : vector<8x128xf32> to vector<8x128xbf16>
    %c0_29 = arith.constant 0 : index
    %c0_30 = arith.constant 0 : index
    %77 = vector.load %arg13[%c0_29, %c0_30] : memref<128x128xbf16, #tpu.memory_space<vmem>>, vector<128x128xbf16>
    %cst_31 = arith.constant dense<0.000000e+00> : vector<8x128xf32>
    %78 = tpu.matmul %76, %77, %cst_31 {dimension_numbers = #tpu.dot_dimension_numbers<[1], [0], [0], [1], [0, 0, 1, 1], [], []>} : vector<8x128xbf16>, vector<128x128xbf16>, vector<8x128xf32> -> vector<8x128xf32>
    %c0_32 = arith.constant 0 : index
    %c0_33 = arith.constant 0 : index
    %79 = vector.load %arg14[%c0_32, %c0_33] : memref<1x128xf32, #tpu.memory_space<vmem>>, vector<1x128xf32>
    %80 = vector.broadcast %79 : vector<1x128xf32> to vector<8x128xf32>
    %81 = arith.addf %78, %80 : vector<8x128xf32>
    %82 = arith.addf %81, %75 : vector<8x128xf32>
    %c0_34 = arith.constant 0 : index
    %c0_35 = arith.constant 0 : index
    %83 = vector.load %arg15[%c0_34, %c0_35] : memref<1x128xf32, #tpu.memory_space<vmem>>, vector<1x128xf32>
    %84 = vector.broadcast %83 : vector<1x128xf32> to vector<8x128xf32>
    %85 = arith.mulf %82, %84 : vector<8x128xf32>
    %cst_36 = arith.constant dense<0.000000e+00> : vector<8xf32>
    %86 = vector.multi_reduction <add>, %85, %cst_36 [1] : vector<8x128xf32> to vector<8xf32>
    %87 = vector.shape_cast %86 : vector<8xf32> to vector<8x1xf32>
    %c0_37 = arith.constant 0 : index
    %c0_38 = arith.constant 0 : index
    %88 = vector.load %arg16[%c0_37, %c0_38] : memref<1x1xf32, #tpu.memory_space<vmem>>, vector<1x1xf32>
    %89 = vector.broadcast %88 : vector<1x1xf32> to vector<8x1xf32>
    %90 = arith.addf %87, %89 : vector<8x1xf32>
    %91 = vector.shape_cast %90 : vector<8x1xf32> to vector<8x1xf32>
    %92 = vector.broadcast %91 : vector<8x1xf32> to vector<8x128xf32>
    %c0_39 = arith.constant 0 : index
    %c0_40 = arith.constant 0 : index
    %93 = vector.load %arg17[%c0_39, %c0_40] : memref<8x128xf32, #tpu.memory_space<vmem>>, vector<8x128xf32>
    tpu.vector_store %arg17[%c0_39, %c0_40], %92 {strides = array<i32>} : memref<8x128xf32, #tpu.memory_space<vmem>>, vector<8x128xf32>,
    return
  }
  func.func @transform_0(%arg0: i32) -> (i32, i32) {
    %c0_i32 = arith.constant 0 : i32
    %c0_i32_0 = arith.constant 0 : i32
    return %arg0, %c0_i32 : i32, i32
  }
  func.func @transform_1(%arg0: i32) -> (i32, i32) {
    %c0_i32 = arith.constant 0 : i32
    %c0_i32_0 = arith.constant 0 : i32
    return %arg0, %c0_i32 : i32, i32
  }
  func.func @transform_2(%arg0: i32) -> (i32, i32) {
    %c0_i32 = arith.constant 0 : i32
    %c0_i32_0 = arith.constant 0 : i32
    %c0_i32_1 = arith.constant 0 : i32
    return %c0_i32, %c0_i32_0 : i32, i32
  }
  func.func @transform_3(%arg0: i32) -> (i32, i32) {
    %c0_i32 = arith.constant 0 : i32
    %c0_i32_0 = arith.constant 0 : i32
    %c0_i32_1 = arith.constant 0 : i32
    return %c0_i32, %c0_i32_0 : i32, i32
  }
  func.func @transform_4(%arg0: i32) -> (i32, i32) {
    %c0_i32 = arith.constant 0 : i32
    %c0_i32_0 = arith.constant 0 : i32
    %c0_i32_1 = arith.constant 0 : i32
    return %c0_i32, %c0_i32_0 : i32, i32
  }
  func.func @transform_5(%arg0: i32) -> (i32, i32) {
    %c0_i32 = arith.constant 0 : i32
    %c0_i32_0 = arith.constant 0 : i32
    %c0_i32_1 = arith.constant 0 : i32
    return %c0_i32, %c0_i32_0 : i32, i32
  }
  func.func @transform_6(%arg0: i32) -> (i32, i32) {
    %c0_i32 = arith.constant 0 : i32
    %c0_i32_0 = arith.constant 0 : i32
    %c0_i32_1 = arith.constant 0 : i32
    return %c0_i32, %c0_i32_0 : i32, i32
  }
  func.func @transform_7(%arg0: i32) -> (i32, i32) {
    %c0_i32 = arith.constant 0 : i32
    %c0_i32_0 = arith.constant 0 : i32
    %c0_i32_1 = arith.constant 0 : i32
    return %c0_i32, %c0_i32_0 : i32, i32
  }
  func.func @transform_8(%arg0: i32) -> (i32, i32) {
    %c0_i32 = arith.constant 0 : i32
    %c0_i32_0 = arith.constant 0 : i32
    %c0_i32_1 = arith.constant 0 : i32
    return %c0_i32, %c0_i32_0 : i32, i32
  }
  func.func @transform_9(%arg0: i32) -> (i32, i32) {
    %c0_i32 = arith.constant 0 : i32
    %c0_i32_0 = arith.constant 0 : i32
    %c0_i32_1 = arith.constant 0 : i32
    return %c0_i32, %c0_i32_0 : i32, i32
  }
  func.func @transform_10(%arg0: i32) -> (i32, i32) {
    %c0_i32 = arith.constant 0 : i32
    %c0_i32_0 = arith.constant 0 : i32
    %c0_i32_1 = arith.constant 0 : i32
    return %c0_i32, %c0_i32_0 : i32, i32
  }
  func.func @transform_11(%arg0: i32) -> (i32, i32) {
    %c0_i32 = arith.constant 0 : i32
    %c0_i32_0 = arith.constant 0 : i32
    %c0_i32_1 = arith.constant 0 : i32
    return %c0_i32, %c0_i32_0 : i32, i32
  }
  func.func @transform_12(%arg0: i32) -> (i32, i32) {
    %c0_i32 = arith.constant 0 : i32
    %c0_i32_0 = arith.constant 0 : i32
    %c0_i32_1 = arith.constant 0 : i32
    return %c0_i32, %c0_i32_0 : i32, i32
  }
  func.func @transform_13(%arg0: i32) -> (i32, i32) {
    %c0_i32 = arith.constant 0 : i32
    %c0_i32_0 = arith.constant 0 : i32
    %c0_i32_1 = arith.constant 0 : i32
    return %c0_i32, %c0_i32_0 : i32, i32
  }
  func.func @transform_14(%arg0: i32) -> (i32, i32) {
    %c0_i32 = arith.constant 0 : i32
    %c0_i32_0 = arith.constant 0 : i32
    %c0_i32_1 = arith.constant 0 : i32
    return %c0_i32, %c0_i32_0 : i32, i32
  }
  func.func @transform_15(%arg0: i32) -> (i32, i32) {
    %c0_i32 = arith.constant 0 : i32
    %c0_i32_0 = arith.constant 0 : i32
    %c0_i32_1 = arith.constant 0 : i32
    return %c0_i32, %c0_i32_0 : i32, i32
  }
  func.func @transform_16(%arg0: i32) -> (i32, i32) {
    %c0_i32 = arith.constant 0 : i32
    %c0_i32_0 = arith.constant 0 : i32
    return %arg0, %c0_i32 : i32, i32
  }
}

</mosaic_0001>

<bundles_post_ra>
// kernel: tpu_custom_call.1
= control target key start
LH: loop header
LB: loop body
LE: loop exit
PB: predicated region body
PF: predicated region fallthrough
CT: control target
= control target key end

     0   :  { %s2986_s0 = inlined_call_operand.hbm [shape: f32[16,128], index: 0, kind: input, shape index: {}]   ;;  %s2987_s1 = inlined_call_operand.hbm [shape: f32[16,128], index: 1, kind: input, shape index: {}]   ;;  %s2988_s2 = inlined_call_operand.vmem [shape: bf16[128,128], index: 2, kind: input, shape index: {}]   ;;  %s2989_s3 = inlined_call_operand.hbm [shape: f32[1,128], index: 3, kind: input, shape index: {}]   ;;  %s2990_s4 = inlined_call_operand.hbm [shape: bf16[128,128], index: 4, kind: input, shape index: {}]   ;;  %s2991_s5 = inlined_call_operand.vmem [shape: f32[1,128], index: 5, kind: input, shape index: {}]   ;;  %s2992_s6 = inlined_call_operand.hbm [shape: bf16[128,384], index: 6, kind: input, shape index: {}]   ;;  %s2993_s7 = inlined_call_operand.vmem [shape: f32[1,384], index: 7, kind: input, shape index: {}]   ;;  %s2994_s8 = inlined_call_operand.vmem [shape: bf16[128,8], index: 8, kind: input, shape index: {}]   ;;  %s2995_s9 = inlined_call_operand.vmem [shape: bf16[8,128], index: 9, kind: input, shape index: {}]   ;;  %s2996_s10 = inlined_call_operand.hbm [shape: bf16[128,128], index: 10, kind: input, shape index: {}]   ;;  %s2997_s11 = inlined_call_operand.vmem [shape: f32[1,128], index: 11, kind: input, shape index: {}]   ;;  %s2998_s12 = inlined_call_operand.hbm [shape: bf16[128,128], index: 12, kind: input, shape index: {}]   ;;  %s2999_s13 = inlined_call_operand.vmem [shape: f32[1,128], index: 13, kind: input, shape index: {}]   ;;  %s3000_s14 = inlined_call_operand.vmem [shape: f32[1,128], index: 14, kind: input, shape index: {}]   ;;  %s3001_s15 = inlined_call_operand.<no memory space> [shape: f32[1,1], index: 15, kind: input, shape index: {}]   ;;  %s3002_s16 = inlined_call_operand.hbm [shape: f32[16,128], index: 16, kind: output, shape index: {}]  }
   0x1   :  { %3017 = sst [smem:[#allocation28_spill]] %s2986_s0  ;;  %v21_v0 = vstv %s3001_s15 }
   0x2   :  { %3018 = sst [smem:[#allocation29_spill]] %s2989_s3  ;;  %22 = vst [vmem:[#allocation2] sm:$0x1] %v21_v0 }
   0x3   :  { %3019 = sst [smem:[#allocation30_spill]] %s2990_s4 }
   0x4   :  { %3020 = sst [smem:[#allocation31_spill]] %s2992_s6 }
   0x5   :  { %3021 = sst [smem:[#allocation32_spill]] %s2996_s10 }
   0x6   :  { %3022 = sst [smem:[#allocation33_spill]] %s2998_s12 }
   0x7   :  { %3023 = sst [smem:[#allocation34_spill]] %s3002_s16 }
   0x8   :  { %23 = vsyncpa [#allocation4], 0 }
   0x9   :  { %25 = vsyncpa [#allocation4 + $0x1], 0 }
   0xa   :  { %26 = vsyncpa [#allocation7], 0 }
   0xb   :  { %28 = vsyncpa [#allocation7 + $0x1], 0 }
   0xc   :  { %29 = vsyncpa [#allocation10], 0 }
   0xd   :  { %30 = vsyncpa [#allocation13], 0 }
   0xe   :  { %31 = vsyncpa [#allocation5], 0 }
   0xf   :  { %33 = vsyncpa [#allocation5 + $0x1], 0  ;;  %s2580_s23 = smov 0   ;;  %s2582_s24 = smov 0  }
  0x10   :  { %s2584_s25 = smov 0   ;;  %s2586_s26 = smov 0  }
  0x11 LB: > { %3024 = sst [smem:[#allocation22_spill]] %s2463_s23  ;;  %s2477_s15 = smov [#allocation8]   ;;  %s2475_s26 = sphi %s2586_s26, %s3059_s26   ;;  %s2471_s25 = sphi %s2584_s25, %s3061_s25   ;;  %s2467_s24 = sphi %s2582_s24, %s3063_s24   ;;  %s2463_s23 = sphi %s2580_s23, %s3062_s23  }
  0x12   : > { %3025 = sst [smem:[#allocation23_spill]] %s2471_s25  ;;  %s432_s27 = sshll.u32 %s2477_s15, 4  ;;  %s433_s27 = int_to_ptr.vmem [resolvable:$true] %s432_s27 }
  0x13   : > { %s2601_s28 = sadd.s32 4294967295, %s2475_s26   ;;  %p1737_p0 = scmp.ge.s32.totalorder %s2475_s26, 1 }
  0x14   : > { %p3013_p1 = scmp.eq.s32.totalorder %s2601_s28, 0  ;;  %p416_p2 = scmp.lt.s32.totalorder %s2475_s26, 3 }
  0x15   : > { %s2478_s30 = smov [#allocation9]   ;;  %s2479_s18 = smov [#allocation12]  }
  0x16   : > { %p2606_p3 = pnand %p1737_p0, %p416_p2  ;;  %s442_s0 = sshll.u32 %s2478_s30, 4  ;;  %s2613_s0 = int_to_ptr.vmem [resolvable:$true] %s442_s0 }
  0x17   : > { %s480_s19 = sshll.u32 %s2479_s18, 4  ;;  %s2220_s21 = scalar_lea.vmem %s433_s27, 16  ;;  %s2621_s19 = int_to_ptr.vmem [resolvable:$true] %s480_s19 }
  0x18   : > { %s3026_s29 = scalar_select %p2606_p3, 1, 0 }
  0x19   : > { %p2041_p5 = pneg %p2606_p3  ;;  %p2221_p8 = scmp.ne.s32.totalorder %s433_s27, %s2220_s21 }
  0x1a   : > { %s2227_s22 = scalar_lea.vmem %s433_s27, 32  ;;  %p2228_p11 = scmp.lt.s32.totalorder %s433_s27, %s433_s27 }
  0x1b   : > { %p2617_p6 = pnand %p2041_p5, %p3013_p1  ;;  %p2229_p12 = scmp.lt.s32.totalorder %s2227_s22, %s2220_s21 }
  0x1d   : > { %p2625_p7 = pneg %p2617_p6  ;;  %p2230_p13 = por %p2229_p12, %p2228_p11 }
  0x1f   : > { %p2223_p9 = pnand %p2221_p8, %p2625_p7 }
  0x21   : > { %p2224_p10 = pneg %p2223_p9 }
  0x23   : > { %p2231_p0 = pnand %p2230_p13, %p2224_p10 }
  0x25   : > { %2234 = shalt.err (!%p2231_p0)
}
  0x26   : > { %s3029_s3 = sld [smem:[#allocation29_spill]]  ;;  %s2246_s18 = scalar_lea.vmem %s2613_s0, 1024 }
  0x27   : > { %p2247_p2 = scmp.ne.s32.totalorder %s2613_s0, %s2246_s18  ;;  %p2254_p9 = scmp.lt.s32.totalorder %s2613_s0, %s2613_s0 }
  0x28   : > { %p2255_p11 = scmp.lt.s32.totalorder %s2246_s18, %s2246_s18 }
  0x29   : > { %p2249_p5 = pnand %p2247_p2, %p2625_p7 }
  0x2a   : > { %p2256_p10 = por %p2255_p11, %p2254_p9 }
  0x2b   : > { %p2250_p8 = pneg %p2249_p5 }
  0x2c   : > { %2044 = dma.hbm_to_vmem [thread:$0]  (!%p2617_p6), %s3029_s3, 16, %s433_s27, [#allocation7]  }
  0x2d   : > { %p2257_p12 = pnand %p2256_p10, %p2250_p8 }
  0x2f   : > { %2260 = shalt.err (!%p2257_p12)
}
  0x30   : > { %s3004_s21 = smov 64   ;;  %s2481_s22 = smov 4  }
  0x31   : > { %s3030_s4 = sld [smem:[#allocation30_spill]]  ;;  %s2272_s30 = scalar_lea.vmem %s2621_s19, 1024 }
  0x32   : > { %p2273_p13 = scmp.ne.s32.totalorder %s2621_s19, %s2272_s30  ;;  %p2280_p5 = scmp.lt.s32.totalorder %s2621_s19, %s2621_s19 }
  0x33   : > { %p2281_p8 = scmp.lt.s32.totalorder %s2272_s30, %s2272_s30 }
  0x34   : > { %p2275_p0 = pnand %p2273_p13, %p2625_p7 }
  0x35   : > { %p2282_p9 = por %p2281_p8, %p2280_p5 }
  0x36   : > { %p2276_p2 = pneg %p2275_p0 }
  0x37   : > { %2047 = dma.hbm_to_vmem [thread:$0]  (!%p2617_p6), %s3030_s4, 1024, %s2613_s0, [#allocation10], %s3004_s21, %s3004_s21, %s2481_s22  }
  0x38   : > { %p2283_p11 = pnand %p2282_p9, %p2276_p2 }
  0x3a   : > { %2286 = shalt.err (!%p2283_p11)
}
  0x3b   : > { %s3031_s10 = sld [smem:[#allocation32_spill]]  ;;  %s2482_s0 = smov [#allocation11]  }
  0x3c   : > { %s458_s15 = sshll.u32 %s2482_s0, 4  ;;  %s459_s15 = int_to_ptr.vmem [resolvable:$true] %s458_s15 }
  0x3d   : > { %s2298_s3 = scalar_lea.vmem %s459_s15, 3072  ;;  %p2306_p0 = scmp.lt.s32.totalorder %s459_s15, %s459_s15 }
  0x3e   : > { %p2299_p10 = scmp.ne.s32.totalorder %s459_s15, %s2298_s3  ;;  %p2307_p2 = scmp.lt.s32.totalorder %s2298_s3, %s2298_s3 }
  0x40   : > { %p2301_p12 = pnand %p2299_p10, %p2625_p7  ;;  %p2308_p5 = por %p2307_p2, %p2306_p0 }
  0x41   : > { %2053 = dma.hbm_to_vmem [thread:$0]  (!%p2617_p6), %s3031_s10, 1024, %s2621_s19, [#allocation13], %s3004_s21, %s3004_s21, %s2481_s22  }
  0x42   : > { %p2302_p13 = pneg %p2301_p12 }
  0x44   : > { %p2309_p8 = pnand %p2308_p5, %p2302_p13 }
  0x46   : > { %2312 = shalt.err (!%p2309_p8)
}
  0x47   : > { %s2483_s30 = smov 192   ;;  %s2484_s4 = smov 12  }
  0x48   : > { %s3032_s6 = sld [smem:[#allocation31_spill]]  ;;  %s2485_s27 = smov [#allocation14]  }
  0x49   : > { %s496_s0 = sshll.u32 %s2485_s27, 4  ;;  %s497_s0 = int_to_ptr.vmem [resolvable:$true] %s496_s0 }
  0x4a   : > { %s2324_s21 = scalar_lea.vmem %s497_s0, 1024  ;;  %p2332_p12 = scmp.lt.s32.totalorder %s497_s0, %s497_s0 }
  0x4b   : > { %p2325_p9 = scmp.ne.s32.totalorder %s497_s0, %s2324_s21  ;;  %p2333_p13 = scmp.lt.s32.totalorder %s2324_s21, %s2324_s21 }
  0x4d   : > { %p2327_p11 = pnand %p2325_p9, %p2625_p7  ;;  %p2334_p0 = por %p2333_p13, %p2332_p12 }
  0x4e   : > { %2050 = dma.hbm_to_vmem [thread:$0]  (!%p2617_p6), %s3032_s6, 3072, %s459_s15, [#allocation10], %s2483_s30, %s2483_s30, %s2484_s4  }
  0x4f   : > { %p2328_p10 = pneg %p2327_p11 }
  0x51   : > { %p2335_p2 = pnand %p2334_p0, %p2328_p10 }
  0x53   : > { %2338 = shalt.err (!%p2335_p2)
}
  0x54   : > { %s3033_s3 = smov 64   ;;  %s3034_s12 = sld [smem:[#allocation33_spill]] }
  0x55   : > { %s1736_s17 = sadd.s32 4294967294, %s2475_s26   ;;  %s2685_s20 = sadd.s32 1, %s2475_s26  }
  0x56   : > { %3035 = sst [smem:[#allocation24_spill]] %s2685_s20  ;;  %s46_s21 = sadd.s32 1, %s2471_s25 }
  0x57   : > { %s43_s15 = ssub.s32 %s2475_s26, %s2685_s20  ;;  %p53_p7 = scmp.ne.s32.totalorder %s2471_s25, %s2467_s24 }
  0x58   : > { %p44_p5 = scmp.eq.s32.totalorder %s43_s15, 0  ;;  %p54_p8 = scmp.eq.s32.totalorder %s2475_s26, 0 }
  0x59   : > { %p59_p9 = scmp.ne.s32.totalorder %s2467_s24, %s2463_s23  ;;  %p403_p11 = scmp.eq.s32.totalorder %s2601_s28, 1 }
  0x5a   : > { %2056 = dma.hbm_to_vmem [thread:$0]  (!%p2617_p6), %s3034_s12, 1024, %s497_s0, [#allocation13], %s3033_s3, %s3033_s3, %s2481_s22  }
  0x5b   : > { %s2697_s30 = scalar_select %p44_p5, %s2471_s25, %s46_s21  }
  0x5c   : > { %p55_p10 = por %p54_p8, %p53_p7  ;;  %p2701_p12 = por %p3013_p1, %p59_p9 }
  0x5d   : > { %3036 = sst [smem:[#allocation25_spill]] %s2697_s30  ;;  %p2705_p6 = por %p403_p11, %p53_p7 }
  0x5e   : > { %s3037_s19 = scalar_select %p2701_p12, 1, 0 }
  0x5f   : > { %s3038_s22 = scalar_select %p2705_p6, 1, 0 }
  0x60   : > { %p409_p13 = scmp.eq.s32.totalorder %s1736_s17, 1  ;;  %p2073_p0 = scmp.lt.s32.totalorder %s2475_s26, 2 }
  0x61   : > { %3039 = sst [smem:[#allocation26_spill]] %s3038_s22  ;;  %s519_s27 = sand.u32 1, %s2471_s25  }
  0x62   : > { %p2711_p2 = por %p409_p13, %p59_p9  ;;  %s2715_s3 = sshll.u32 %s519_s27, 3 }
  0x63   : > { %s1745_s18 = sshll.u32 %s2475_s26, 7  ;;  %s3042_s15 = sld [smem:[#allocation28_spill]] }
  0x64   : > { %s3040_s0 = scalar_select %p2711_p2, 1, 0 }
  0x65   : > { %s523_s10 = scalar_lea.vmem [#allocation3], %s2715_s3  ;;  %p2724_p7 = pnand %p2073_p0, %p55_p10 }
  0x66   : > { %3041 = sst [smem:[#allocation27_spill]] %s3040_s0  ;;  %s530_s17 = sshll.u32 %s523_s10, 4  ;;  %s531_s17 = int_to_ptr.vmem [resolvable:$true] %s530_s17 }
  0x67   : > { %s2731_s20 = scalar_lea.hbm %s2987_s1, %s1745_s18  ;;  %s520_s4 = scalar_lea.sflag [#allocation4], %s519_s27 }
  0x68   : > { %p2341_p8 = pneg %p2724_p7 }
  0x69   : > { %s2721_s6 = scalar_lea.hbm %s3042_s15, %s1745_s18  ;;  %s2344_s23 = scalar_lea.hbm %s3042_s15, 256 }
  0x6a   : > { %s2339_s21 = scalar_lea.hbm %s2721_s6, 128  ;;  %p2345_p10 = scmp.lt.s32.totalorder %s2721_s6, %s3042_s15 }
  0x6b   : > { %p2340_p5 = scmp.ne.s32.totalorder %s2721_s6, %s2339_s21  ;;  %p2346_p13 = scmp.lt.s32.totalorder %s2344_s23, %s2339_s21 }
  0x6d   : > { %p2342_p9 = pnand %p2341_p8, %p2340_p5  ;;  %p2347_p0 = por %p2346_p13, %p2345_p10 }
  0x6f   : > { %p2343_p11 = pneg %p2342_p9 }
  0x71   : > { %p2348_p4 = pnand %p2347_p0, %p2343_p11 }
  0x73   : > { %2351 = shalt.err (!%p2348_p4)
}
  0x74   : > { %s2352_s25 = scalar_lea.vmem %s531_s17, 128  ;;  %s2486_s30 = smov [#allocation3]  }
  0x75   : > { %p2353_p1 = scmp.ne.s32.totalorder %s531_s17, %s2352_s25  ;;  %s2357_s27 = sshll.u32 %s2486_s30, 4  ;;  %s2358_s27 = int_to_ptr.vmem [resolvable:$false] %s2357_s27 }
  0x76   : > { %s2359_s0 = scalar_lea.vmem %s2358_s27, 256  ;;  %p2360_p9 = scmp.lt.s32.totalorder %s531_s17, %s2358_s27 }
  0x77   : > { %p2355_p2 = pnand %p2353_p1, %p2341_p8  ;;  %p2361_p6 = scmp.lt.s32.totalorder %s2359_s0, %s2352_s25 }
  0x79   : > { %p2356_p5 = pneg %p2355_p2  ;;  %p2362_p12 = por %p2361_p6, %p2360_p9 }
  0x7b   : > { %p2363_p3 = pnand %p2362_p12, %p2356_p5 }
  0x7d   : > { %2366 = shalt.err (!%p2363_p3)
}
  0x7e   : > { %2060 = dma.hbm_to_vmem [thread:$0]  (!%p2724_p7), %s2721_s6, 128, %s531_s17, %s520_s4  }
  0x7f   : > { %s537_s16 = sand.u32 1, %s2475_s26   ;;  %s541_s23 = scalar_lea.vmem [#allocation6], %s2715_s3 }
  0x80   : > { %s548_s22 = sshll.u32 %s541_s23, 4  ;;  %s538_s18 = scalar_lea.sflag [#allocation7], %s537_s16  ;;  %s549_s22 = int_to_ptr.vmem [resolvable:$true] %s548_s22 }
  0x81   : > { %s2367_s21 = scalar_lea.hbm %s2731_s20, 128  ;;  %s2372_s30 = scalar_lea.hbm %s2987_s1, 256 }
  0x82   : > { %p2368_p1 = scmp.ne.s32.totalorder %s2731_s20, %s2367_s21  ;;  %p2373_p12 = scmp.lt.s32.totalorder %s2731_s20, %s2987_s1 }
  0x83   : > { %p2374_p6 = scmp.lt.s32.totalorder %s2372_s30, %s2367_s21 }
  0x84   : > { %p2370_p3 = pnand %p2368_p1, %p2341_p8 }
  0x85   : > { %p2375_p2 = por %p2374_p6, %p2373_p12 }
  0x86   : > { %p2371_p4 = pneg %p2370_p3 }
  0x88   : > { %p2376_p11 = pnand %p2375_p2, %p2371_p4 }
  0x8a   : > { %2379 = shalt.err (!%p2376_p11)
}
  0x8b   : > { %s2380_s6 = scalar_lea.vmem %s549_s22, 128  ;;  %s2487_s3 = smov [#allocation6]  }
  0x8c   : > { %p2381_p10 = scmp.ne.s32.totalorder %s549_s22, %s2380_s6  ;;  %s2385_s17 = sshll.u32 %s2487_s3, 4  ;;  %s2386_s17 = int_to_ptr.vmem [resolvable:$false] %s2385_s17 }
  0x8d   : > { %s2387_s4 = scalar_lea.vmem %s2386_s17, 256  ;;  %p2388_p5 = scmp.lt.s32.totalorder %s549_s22, %s2386_s17 }
  0x8e   : > { %p2383_p13 = pnand %p2381_p10, %p2341_p8  ;;  %p2389_p9 = scmp.lt.s32.totalorder %s2387_s4, %s2380_s6 }
  0x90   : > { %p2384_p0 = pneg %p2383_p13  ;;  %p2390_p1 = por %p2389_p9, %p2388_p5 }
  0x92   : > { %p2391_p3 = pnand %p2390_p1, %p2384_p0 }
  0x94   : > { %2394 = shalt.err (!%p2391_p3)
}
  0x95   : > { %2063 = dma.hbm_to_vmem [thread:$0]  (!%p2724_p7), %s2731_s20, 128, %s549_s22, %s538_s18  }
  0x96   : > { %p3044_p4 = scmp.ne.s32.totalorder %s3026_s29, 0 }
  0x97   : > { %s2776_s16 = sand.u32 (!%p3044_p4), 1, %s2467_s24   ;;  %p3045_p8 = scmp.ne.s32.totalorder (!%p3044_p4), %s3037_s19, 0 }
  0x98   : > { %557 = sbr.rel (%p3044_p4) target bundleno = 1728 (0x6c0), region = 84  ;;  %s2779_s23 = sshll.u32 (!%p3044_p4), %s2776_s16, 3 }
  0x99   : > { %s560_s21 = scalar_lea.sflag (!%p3044_p4), [#allocation4], %s2776_s16  ;;  %s563_s10 = scalar_lea.vmem (!%p3044_p4), [#allocation3], %s2779_s23 }
  0x9d   : > { %2438 = dma.done.wait (%p3045_p8), %s560_s21, 128  }
  0x9e   : > { %2440 = vsyncadd (%p3045_p8), %s560_s21, 4294967168  ;;  %s568_s12 = sand.u32 1, %s2601_s28   ;;  %s572_s20 = scalar_lea.vmem [#allocation6], %s2779_s23 }
  0x9f   : > { %s569_s29 = scalar_lea.sflag [#allocation7], %s568_s12 }
  0xa0   : > { %2442 = dma.done.wait (%p3045_p8), %s569_s29, 128  }
  0xa1   : > { %2444 = vsyncadd (%p3045_p8), %s569_s29, 4294967168  ;;  %p3046_p7 = scmp.eq.s32.totalorder %s2601_s28, 0 }
  0xa3   : > { %2446 = dma.done.wait (%p3046_p7), [#allocation7], 16   ;;  %p3047_p12 = pmov %p3046_p7 }
  0xa4   : > { %p3048_p6 = pmov %p3046_p7 }
  0xa5   : > { %2448 = vsyncadd (%p3047_p12), [#allocation7], 4294967280 }
  0xa6   : > { %2450 = dma.done.wait (%p3048_p6), [#allocation10], 4096   ;;  %p3049_p2 = pmov %p3048_p6 }
  0xa8   : > { %2452 = vsyncadd (%p3049_p2), [#allocation10], 4294963200  ;;  %p3050_p11 = pmov %p3049_p2 }
  0xa9   : > { %p3051_p10 = pmov %p3049_p2 }
  0xaa   : > { %2454 = dma.done.wait (%p3050_p11), [#allocation13], 2048  }
  0xab   : > { %2456 = vsyncadd (%p3051_p10), [#allocation13], 4294965248  ;;  %v2488_v1 = vmov 0.0   ;;  %vm2489_vm0 = vmmov 0   ;;  %v2125_v2 = vld [vmem:[%s2988_s2 + $0x38] sm:$0xff]   ;;  %v2127_v4 = vld [vmem:[%s2988_s2 + $0x30] sm:$0xff]  }
  0xac   : > { %1889 = vmatprep.subr.bf16.mxu0 %v2488_v1  ;;  %1909 = vmatprep.subr.bf16.mxu1 %v2488_v1  ;;  %v2126_v3 = vld [vmem:[#allocation9 + $0x38] sm:$0xff]   ;;  %v2128_v5 = vld [vmem:[#allocation9 + $0x30] sm:$0xff]   ;;  %v2129_v6 = vld [vmem:[%s2988_s2 + $0x28] sm:$0xff]   ;;  %v2490_v46 = vmov 0   ;;  %vm1284_vm1 = vcmask 1043456   ;;  %vm1280_vm2 = vcmask 64512  }
  0xad   : > { %1905 = vmatprep.mubr.msk.bf16.mxu0 %vm2489_vm0, %v2488_v1  ;;  %1925 = vmatprep.mubr.msk.bf16.mxu1 %vm2489_vm0, %v2488_v1  ;;  %v2130_v7 = vld [vmem:[#allocation9 + $0x28] sm:$0xff]   ;;  %v2131_v8 = vld [vmem:[%s2988_s2 + $0x20] sm:$0xff]   ;;  %v2133_v10 = vld [vmem:[%s2988_s2 + $0x18] sm:$0xff]   ;;  %s3052_s12 = sld [smem:[#allocation26_spill]]  ;;  %s645_s29 = scalar_lea.vmem [#allocation15], %s2779_s23 }
  0xae   : > { %1890 = vmatpush3.bf16.msra.mxu0 %v2125_v2  ;;  %1910 = vmatpush3.bf16.msra.mxu1 %v2126_v3  ;;  %v2132_v9 = vld [vmem:[#allocation9 + $0x20] sm:$0xff]   ;;  %v2134_v11 = vld [vmem:[#allocation9 + $0x18] sm:$0xff]   ;;  %v2135_v12 = vld [vmem:[%s2988_s2 + $0x10] sm:$0xff]   ;;  %s1596_s19 = sshll.u32 %s645_s29, 4  ;;  %s1829_s22 = sshll.u32 %s2601_s28, 7  ;;  %s2946_s19 = int_to_ptr.vmem [resolvable:$true] %s1596_s19 }
  0xaf   : > { %1891 = vmatprep.subr.bf16.mxu0 %v2488_v1  ;;  %1911 = vmatprep.subr.bf16.mxu1 %v2488_v1  ;;  %v2136_v13 = vld [vmem:[#allocation9 + $0x10] sm:$0xff]   ;;  %v2137_v14 = vld [vmem:[%s2988_s2 + $0x8] sm:$0xff]   ;;  %v2139_v16 = vld [vmem:[%s2988_s2] sm:$0xff]   ;;  %s3053_s18 = sld [smem:[#allocation34_spill]]  ;;  %s1583_s30 = scalar_lea.sflag [#allocation5], %s2776_s16 }
  0xb0   : > { %v2138_v15 = vld [vmem:[#allocation9 + $0x8] sm:$0xff]   ;;  %v2140_v17 = vld [vmem:[#allocation9] sm:$0xff]   ;;  %v2144_v24 = vld [vmem:[#allocation11 + $0xb0] ss:$12 sps:$4 sm:$0xff]   ;;  %2124 = vset.pattern.permute.xlu0 %v2490_v46  ;;  %s2395_s27 = scalar_lea.vmem %s2946_s19, 128  ;;  %s2491_s23 = smov [#allocation15]  }
  0xb1   : > { %v647_v18 = vld [vmem:[%s563_s10] sm:$0xff]  ;;  %v760_v19 = vld [vmem:[%s572_s20] sm:$0xff]  ;;  %p2396_p13 = scmp.ne.s32.totalorder %s2946_s19, %s2395_s27  ;;  %s2399_s0 = sshll.u32 %s2491_s23, 4  ;;  %s2400_s0 = int_to_ptr.vmem [resolvable:$false] %s2399_s0 }
  0xb2   : > { %1892 = vmatpush3.bf16.msra.mxu0 %v2127_v4  ;;  %1912 = vmatpush3.bf16.msra.mxu1 %v2128_v5  ;;  %v2143_v20 = vld [vmem:[#allocation11 + $0xac] ss:$12 sps:$4 sm:$0xff]   ;;  %v648_v21 = vpack.c.bf16 %v647_v18, %v647_v18  ;;  %v761_v22 = vpack.c.bf16 %v760_v19, %v760_v19  ;;  %v2141_v23 = vld [vmem:[#allocation11 + $0xa8] ss:$12 sps:$4 sm:$0xff]   ;;  %v2145_v26 = vld [vmem:[#allocation11 + $0x90] ss:$12 sps:$4 sm:$0xff]   ;;  %v908_v5 = vlaneseq  ;;  %p2402_p1 = scmp.lt.s32.totalorder %s2946_s19, %s2400_s0 }
  0xb3   : > { %1893 = vmatprep.subr.bf16.mxu0 %v2488_v1  ;;  %1913 = vmatprep.subr.bf16.mxu1 %v2488_v1  ;;  %v2147_v25 = vld [vmem:[#allocation11 + $0x94] ss:$12 sps:$4 sm:$0xff]   ;;  %v2148_v27 = vld [vmem:[#allocation11 + $0x98] ss:$12 sps:$4 sm:$0xff]   ;;  %v2151_v28 = vld [vmem:[#allocation11 + $0x7c] ss:$12 sps:$4 sm:$0xff]  }
  0xb4   : > { %v2149_v29 = vld [vmem:[#allocation11 + $0x78] ss:$12 sps:$4 sm:$0xff]   ;;  %v2152_v30 = vld [vmem:[#allocation11 + $0x80] ss:$12 sps:$4 sm:$0xff]   ;;  %v2156_v33 = vld [vmem:[#allocation11 + $0x68] ss:$12 sps:$4 sm:$0xff]  }
  0xb5   : > { %v2155_v31 = vld [vmem:[#allocation11 + $0x64] ss:$12 sps:$4 sm:$0xff]   ;;  %v2153_v32 = vld [vmem:[#allocation11 + $0x60] ss:$12 sps:$4 sm:$0xff]   ;;  %v2157_v35 = vld [vmem:[#allocation11 + $0x48] ss:$12 sps:$4 sm:$0xff]   ;;  %s1594_s25 = scalar_lea.hbm %s3053_s18, %s1829_s22 }
  0xb6   : > { %1894 = vmatpush3.bf16.msra.mxu0 %v2129_v6  ;;  %1914 = vmatpush3.bf16.msra.mxu1 %v2130_v7  ;;  %v2159_v34 = vld [vmem:[#allocation11 + $0x4c] ss:$12 sps:$4 sm:$0xff]   ;;  %v2160_v36 = vld [vmem:[#allocation11 + $0x50] ss:$12 sps:$4 sm:$0xff]   ;;  %v2163_v37 = vld [vmem:[#allocation11 + $0x34] ss:$12 sps:$4 sm:$0xff]  }
  0xb7   : > { %1895 = vmatprep.subr.bf16.mxu0 %v2488_v1  ;;  %1915 = vmatprep.subr.bf16.mxu1 %v2488_v1  ;;  %v2161_v38 = vld [vmem:[#allocation11 + $0x30] ss:$12 sps:$4 sm:$0xff]   ;;  %v2164_v39 = vld [vmem:[#allocation11 + $0x38] ss:$12 sps:$4 sm:$0xff]   ;;  %v2168_v42 = vld [vmem:[#allocation11 + $0x20] ss:$12 sps:$4 sm:$0xff]  }
  0xb8   : > { %v2167_v40 = vld [vmem:[#allocation11 + $0x1c] ss:$12 sps:$4 sm:$0xff]   ;;  %v2165_v41 = vld [vmem:[#allocation11 + $0x18] ss:$12 sps:$4 sm:$0xff]   ;;  %v2169_v44 = vld [vmem:[#allocation11] ss:$12 sps:$4 sm:$0xff]  }
  0xb9   : > { %v2171_v43 = vld [vmem:[#allocation11 + $0x4] ss:$12 sps:$4 sm:$0xff]   ;;  %v2172_v45 = vld [vmem:[#allocation11 + $0x8] ss:$12 sps:$4 sm:$0xff]   ;;  %v1757_v48 = vld [vmem:[#allocation8] ss:$0 sm:$0xff] }
  0xba   : > { %1896 = vmatpush3.bf16.msra.mxu0 %v2131_v8  ;;  %1916 = vmatpush3.bf16.msra.mxu1 %v2132_v9  ;;  %v2173_v47 = vld [vmem:[%s2994_s8 + $0x38] sm:$0xff]   ;;  %v1766_v49 = vld [vmem:[%s2991_s5] ss:$0 sm:$0xff]  ;;  %v2174_v58 = vld [vmem:[%s2994_s8 + $0x30] sm:$0xff]   ;;  %v2894_v6 = vshrl.u32 %v908_v5, 7  ;;  %p3054_p0 = scmp.ne.s32.totalorder %s3052_s12, 0 }
  0xbb   : > { %1897 = vmatprep.subr.bf16.mxu0 %v2488_v1  ;;  %1917 = vmatprep.subr.bf16.mxu1 %v2488_v1  ;;  %v2175_v62 = vld [vmem:[%s2994_s8 + $0x28] sm:$0xff]   ;;  %v2176_v63 = vld [vmem:[%s2994_s8 + $0x20] sm:$0xff]   ;;  %v2177_v0 = vld [vmem:[%s2994_s8 + $0x18] sm:$0xff]   ;;  %s2401_s28 = scalar_lea.vmem %s2400_s0, 256 }
  0xbc   : > { %v2178_v2 = vld [vmem:[%s2994_s8 + $0x10] sm:$0xff]   ;;  %v2179_v3 = vld [vmem:[%s2994_s8 + $0x8] sm:$0xff]   ;;  %v2180_v4 = vld [vmem:[%s2994_s8] sm:$0xff]   ;;  %v914_v7 = vsub.s32 1, %v2894_v6  ;;  %v910_v8 = vsub.s32 0, %v2894_v6  ;;  %p2397_p5 = pnand %p2396_p13, %p3054_p0  ;;  %p2403_p3 = scmp.lt.s32.totalorder %s2401_s28, %s2395_s27 }
  0xbd   : > { %v2901_v9 = vld [vmem:[%s2993_s7] sm:$0x7]  ;;  %v2188_v5 = vld [vmem:[#allocation12] sm:$0xff]  }
  0xbe   : > { %1898 = vmatpush3.bf16.msra.mxu0 %v2133_v10  ;;  %1918 = vmatpush3.bf16.msra.mxu1 %v2134_v11  ;;  %p2398_p9 = pneg %p2397_p5  ;;  %p2404_p4 = por %p2403_p3, %p2402_p1 }
  0xbf   : > { %1899 = vmatprep.subr.bf16.mxu0 %v2488_v1  ;;  %1919 = vmatprep.subr.bf16.mxu1 %v2488_v1 }
  0xc0   : > { %p2405_p8 = pnand %p2404_p4, %p2398_p9 }
  0xc2   : > { %1900 = vmatpush3.bf16.msra.mxu0 %v2135_v12  ;;  %1920 = vmatpush3.bf16.msra.mxu1 %v2136_v13  ;;  %v915_v12 = vrot.slane %v2901_v9, %v914_v7  ;;  %v2189_v7 = vld [vmem:[#allocation14 + $0x38] sm:$0xff]  }
  0xc3   : > { %1901 = vmatprep.subr.bf16.mxu0 %v2488_v1  ;;  %1921 = vmatprep.subr.bf16.mxu1 %v2488_v1 }
  0xc6   : > { %1902 = vmatpush3.bf16.msra.mxu0 %v2137_v14  ;;  %1922 = vmatpush3.bf16.msra.mxu1 %v2138_v15  ;;  %v911_v15 = vrot.slane %v2901_v9, %v910_v8  ;;  %v2190_v8 = vld [vmem:[#allocation14 + $0x30] sm:$0xff]  }
  0xc7   : > { %1903 = vmatprep.subr.bf16.mxu0 %v2488_v1  ;;  %1923 = vmatprep.subr.bf16.mxu1 %v2488_v1 }
  0xca   : > { %1904 = vmatpush3.bf16.msra.mxu0 %v2139_v16  ;;  %1924 = vmatpush3.bf16.msra.mxu1 %v2140_v17 }
  0xcb   : > { %1051 = vmatprep.subr.bf16.mxu0 %v2143_v20  ;;  %1929 = vmatprep.subr.bf16.mxu1 %v2488_v1 }
  0xcd   : > { %1906 = vmatmul.mubr.bf16.vlgmr.msra.gmra.mxu0 %v648_v21  ;;  %1926 = vmatmul.mubr.bf16.vlgmr.msra.gmra.mxu1 %v761_v22 }
  0xce   : > { %1052 = vmatpush1.bf16.msra.mxu0 %v2141_v23  ;;  %1930 = vmatpush3.bf16.msra.mxu1 %v2144_v24 }
  0xcf   : > { %1053 = vmatprep.subr.bf16.mxu0 %v2147_v25  ;;  %1931 = vmatprep.subr.bf16.mxu1 %v2488_v1 }
  0xd0   : > { %1945 = vmatprep.mubr.msk.bf16.mxu1 %vm2489_vm0, %v2488_v1  ;;  %1083 = vmatprep.mubr.bf16.mxu0 %v2490_v46 }
  0xd2   : > { %1054 = vmatpush1.bf16.msra.mxu0 %v2145_v26  ;;  %1932 = vmatpush3.bf16.msra.mxu1 %v2148_v27 }
  0xd3   : > { %1055 = vmatprep.subr.bf16.mxu0 %v2151_v28  ;;  %1933 = vmatprep.subr.bf16.mxu1 %v2488_v1 }
  0xd6   : > { %1056 = vmatpush1.bf16.msra.mxu0 %v2149_v29  ;;  %1934 = vmatpush3.bf16.msra.mxu1 %v2152_v30  ;;  %v1279_v30 = vld [vmem:[%s2995_s9] sm:$0xf] }
  0xd7   : > { %1057 = vmatprep.subr.bf16.mxu0 %v2155_v31  ;;  %1935 = vmatprep.subr.bf16.mxu1 %v2488_v1  ;;  %v1286_v31 = vsel %vm1284_vm1, %v1279_v30, 0  ;;  %v2196_v30 = vld [vmem:[#allocation14] sm:$0xff]  }
  0xda   : > { %1058 = vmatpush1.bf16.msra.mxu0 %v2153_v32  ;;  %1936 = vmatpush3.bf16.msra.mxu1 %v2156_v33 }
  0xdb   : > { %1059 = vmatprep.subr.bf16.mxu0 %v2159_v34  ;;  %1937 = vmatprep.subr.bf16.mxu1 %v2488_v1 }
  0xde   : > { %1060 = vmatpush1.bf16.msra.mxu0 %v2157_v35  ;;  %1938 = vmatpush3.bf16.msra.mxu1 %v2160_v36 }
  0xdf   : > { %1061 = vmatprep.subr.bf16.mxu0 %v2163_v37  ;;  %1939 = vmatprep.subr.bf16.mxu1 %v2488_v1 }
  0xe2   : > { %1062 = vmatpush1.bf16.msra.mxu0 %v2161_v38  ;;  %1940 = vmatpush3.bf16.msra.mxu1 %v2164_v39 }
  0xe3   : > { %1063 = vmatprep.subr.bf16.mxu0 %v2167_v40  ;;  %1941 = vmatprep.subr.bf16.mxu1 %v2488_v1 }
  0xe6   : > { %1064 = vmatpush1.bf16.msra.mxu0 %v2165_v41  ;;  %1942 = vmatpush3.bf16.msra.mxu1 %v2168_v42 }
  0xe7   : > { %1943 = vmatprep.subr.bf16.mxu1 %v2488_v1  ;;  %1065 = vmatprep.subr.bf16.mxu0 %v2171_v43 }
  0xea   : > { %1066 = vmatpush1.bf16.msra.mxu0 %v2169_v44  ;;  %1944 = vmatpush3.bf16.msra.mxu1 %v2172_v45 }
  0xeb   : > { %1969 = vmatprep.subr.bf16.mxu1 %v2488_v1  ;;  %1949 = vmatprep.subr.bf16.mxu0 %v2173_v47 }
 0x18d   : > { %v754_v50 = vpop.f32.mrf.mxu0  ;;  %v867_v52 = vpop.f32.mrf.mxu1 }
 0x18e   : > { %v755_v51 = vadd.f32 %v1757_v48, %v754_v50  ;;  %v868_v53 = vadd.f32 %v1766_v49, %v867_v52 }
 0x18f   : > { %v1907_v54 = vpop.f32.mrf.mxu0  ;;  %v1927_v55 = vpop.f32.mrf.mxu1 }
 0x190   : > { %v873_v56 = vpack.c.bf16 %v868_v53, %v755_v51 }
 0x191   : > { %v757_v57 = vpop.f32.mrf.mxu0  ;;  %v870_v59 = vpop.f32.mrf.mxu1 }
 0x192   : > { %1084 = vmatmul.mubr.bf16.vlgmr.msra.gmra.mxu0 %v873_v56  ;;  %1946 = vmatmul.mubr.bf16.vlgmr.msra.gmra.mxu1 %v873_v56 }
 0x193   : > { %v1908_v60 = vpop.f32.mrf.mxu0  ;;  %v1928_v61 = vpop.f32.mrf.mxu1  ;;  %1950 = vmatpush3.bf16.msra.mxu0 %v2173_v47  ;;  %1971 = vmatprep.mubr.msk.bf16.mxu1 %vm2489_vm0, %v2488_v1 }
 0x194   : > { %1951 = vmatprep.subr.bf16.mxu0 %v2174_v58  ;;  %1970 = vmatpush3.bf16.msra.mxu1 %v1286_v31  ;;  %v2181_v60 = vld [vmem:[#allocation12 + $0x38] sm:$0xff]  }
 0x195   : > { %1975 = vmatprep.subr.bf16.mxu1 %v2488_v1 }
 0x197   : > { %1952 = vmatpush3.bf16.msra.mxu0 %v2174_v58 }
 0x198   : > { %1953 = vmatprep.subr.bf16.mxu0 %v2175_v62 }
 0x19b   : > { %1954 = vmatpush3.bf16.msra.mxu0 %v2175_v62  ;;  %v2182_v62 = vld [vmem:[#allocation12 + $0x30] sm:$0xff]  }
 0x19c   : > { %1955 = vmatprep.subr.bf16.mxu0 %v2176_v63 }
 0x19f   : > { %1956 = vmatpush3.bf16.msra.mxu0 %v2176_v63  ;;  %v2183_v63 = vld [vmem:[#allocation12 + $0x28] sm:$0xff]  }
 0x1a0   : > { %1957 = vmatprep.subr.bf16.mxu0 %v2177_v0 }
 0x1a3   : > { %1958 = vmatpush3.bf16.msra.mxu0 %v2177_v0  ;;  %v2184_v0 = vld [vmem:[#allocation12 + $0x20] sm:$0xff]  }
 0x1a4   : > { %1959 = vmatprep.subr.bf16.mxu0 %v2178_v2 }
 0x1a7   : > { %1960 = vmatpush3.bf16.msra.mxu0 %v2178_v2  ;;  %v2185_v2 = vld [vmem:[#allocation12 + $0x18] sm:$0xff]  }
 0x1a8   : > { %1961 = vmatprep.subr.bf16.mxu0 %v2179_v3 }
 0x1ab   : > { %1962 = vmatpush3.bf16.msra.mxu0 %v2179_v3  ;;  %v2186_v3 = vld [vmem:[#allocation12 + $0x10] sm:$0xff]  }
 0x1ac   : > { %1963 = vmatprep.subr.bf16.mxu0 %v2180_v4 }
 0x1af   : > { %1964 = vmatpush3.bf16.msra.mxu0 %v2180_v4  ;;  %v2187_v4 = vld [vmem:[#allocation12 + $0x8] sm:$0xff]  }
 0x1b0   : > { %1995 = vmatprep.subr.bf16.mxu0 %v2488_v1 }
 0x252   : > { %v1085_v10 = vpop.f32.mrf.mxu0  ;;  %v2903_v11 = vpop.f32.mrf.mxu1 }
 0x253   : > { %v1086_v22 = vadd.f32 %v1085_v10, %v911_v15  ;;  %v2191_v10 = vld [vmem:[#allocation14 + $0x28] sm:$0xff]  }
 0x254   : > { %v1087_v13 = vpop.f32.mrf.mxu0  ;;  %v1947_v14 = vpop.f32.mrf.mxu1 }
 0x255   : > { %v1088_v18 = vadd.f32 %v1087_v13, %v915_v12  ;;  %v2193_v13 = vld [vmem:[#allocation14 + $0x18] sm:$0xff]   ;;  %v2194_v14 = vld [vmem:[#allocation14 + $0x10] sm:$0xff]  }
 0x256   : > { %v1089_v16 = vpop.f32.mrf.mxu0  ;;  %v2907_v17 = vpop.f32.mrf.mxu1 }
 0x257   : > { %v1090_v19 = vadd.f32 %v1089_v16, %v911_v15  ;;  %v1135_v24 = vmul.f32 %v1088_v18, %v1086_v22  ;;  %v2195_v15 = vld [vmem:[#allocation14 + $0x8] sm:$0xff]   ;;  %v918_v16 = vsub.s32 2, %v2894_v6 }
 0x258   : > { %v1091_v20 = vpop.f32.mrf.mxu0  ;;  %v1948_v21 = vpop.f32.mrf.mxu1 }
 0x259   : > { %v1092_v23 = vadd.f32 %v1091_v20, %v915_v12  ;;  %v1137_v25 = vmul.f32 %v1090_v19, %v1088_v18  ;;  %v2192_v12 = vld [vmem:[#allocation14 + $0x20] sm:$0xff]   ;;  %v919_v18 = vrot.slane %v2901_v9, %v918_v16 }
 0x25b   : > { %v1136_v26 = vmul.f32 %v1092_v23, %v1086_v22  ;;  %v1138_v27 = vmul.f32 %v1092_v23, %v1090_v19  ;;  %v1129_v21 = vadd.f32 %v2903_v11, %v919_v18  ;;  %v1132_v22 = vadd.f32 %v2907_v17, %v919_v18 }
 0x25d   : > { %v1140_v28 = vpack.c.bf16 %v1138_v27, %v1137_v25  ;;  %v1139_v29 = vpack.c.bf16 %v1136_v26, %v1135_v24 }
 0x25f   : > { %1965 = vmatprep.mubr.bf16.mxu0 %v1139_v29 }
 0x260   : > { %1966 = vmatmul.mubr.bf16.vlgmr.msra.gmra.mxu0 %v1140_v28 }
 0x261   : > { %2011 = vmatprep.mubr.msk.bf16.mxu0 %vm2489_vm0, %v2488_v1  ;;  %1996 = vmatpush3.bf16.msra.mxu0 %v2189_v7 }
 0x262   : > { %1997 = vmatprep.subr.bf16.mxu0 %v2488_v1 }
 0x265   : > { %1998 = vmatpush3.bf16.msra.mxu0 %v2190_v8 }
 0x266   : > { %1999 = vmatprep.subr.bf16.mxu0 %v2488_v1 }
 0x269   : > { %2000 = vmatpush3.bf16.msra.mxu0 %v2191_v10 }
 0x26a   : > { %2001 = vmatprep.subr.bf16.mxu0 %v2488_v1 }
 0x26d   : > { %2002 = vmatpush3.bf16.msra.mxu0 %v2192_v12 }
 0x26e   : > { %2003 = vmatprep.subr.bf16.mxu0 %v2488_v1 }
 0x271   : > { %2004 = vmatpush3.bf16.msra.mxu0 %v2193_v13 }
 0x272   : > { %2005 = vmatprep.subr.bf16.mxu0 %v2488_v1 }
 0x275   : > { %2006 = vmatpush3.bf16.msra.mxu0 %v2194_v14 }
 0x276   : > { %2007 = vmatprep.subr.bf16.mxu0 %v2488_v1 }
 0x279   : > { %2008 = vmatpush3.bf16.msra.mxu0 %v2195_v15 }
 0x27a   : > { %2009 = vmatprep.subr.bf16.mxu0 %v2488_v1 }
 0x27d   : > { %2010 = vmatpush3.bf16.msra.mxu0 %v2196_v30 }
 0x320   : > { %v1967_v32 = vpop.f32.mrf.mxu0 }
 0x322   : > { %v1239_v33 = vpop.f32.mrf.mxu0 }
 0x324   : > { %v1968_v34 = vpop.f32.mrf.mxu0 }
 0x325   : > { %v1265_v35 = vmax.f32 %v1967_v32, %v1968_v34 }
 0x326   : > { %v1242_v36 = vpop.f32.mrf.mxu0 }
 0x327   : > { %v1266_v37 = vsub.f32 %v1967_v32, %v1265_v35  ;;  %v1269_v38 = vsub.f32 %v1968_v34, %v1265_v35  ;;  %v1254_v39 = vmax.f32 %v1239_v33, %v1242_v36 }
 0x329   : > { %v1267_v40 = vmul.f32 1.442695, %v1266_v37  ;;  %v1270_v41 = vmul.f32 1.442695, %v1269_v38  ;;  %v1255_v42 = vsub.f32 %v1239_v33, %v1254_v39  ;;  %v1258_v43 = vsub.f32 %v1242_v36, %v1254_v39  ;;  %v1817_v33 = vld [vmem:[%s2999_s13] ss:$0 sm:$0xff] }
 0x32a   : > { %v1826_v37 = vld [vmem:[%s3000_s14] ss:$0 sm:$0xff] }
 0x32b   : > { %2197 = vpow2.f32 %v1267_v40  ;;  %v1256_v44 = vmul.f32 1.442695, %v1255_v42  ;;  %v1259_v45 = vmul.f32 1.442695, %v1258_v43  ;;  %v1827_v42 = vld [vmem:[#allocation2] ss:$0 sm:$0xff] }
 0x32c   : > { %2199 = vpow2.f32 %v1270_v41 }
 0x32d   : > { %2201 = vpow2.f32 %v1256_v44 }
 0x32e   : > { %2203 = vpow2.f32 %v1259_v45 }
 0x338   : > { %v2198_v46 = vpop.eup %2197 }
 0x339   : > { %v2200_v47 = vpop.eup %2199 }
 0x33a   : > { %v2202_v48 = vpop.eup %2201  ;;  %v1272_v49 = vadd.f32 %v2200_v47, %v2198_v46 }
 0x33b   : > { %v2204_v50 = vpop.eup %2203 }
 0x33c   : > { %2205 = vrcp.f32 %v1272_v49  ;;  %v1261_v51 = vadd.f32 %v2204_v50, %v2202_v48 }
 0x33e   : > { %2207 = vrcp.f32 %v1261_v51 }
 0x349   : > { %v2206_v52 = vpop.eup %2205 }
 0x34a   : > { %v1274_v56 = vmul.f32 %v2206_v52, %v2198_v46  ;;  %v1275_v57 = vmul.f32 %v2206_v52, %v2200_v47 }
 0x34b   : > { %v2208_v53 = vpop.eup %2207 }
 0x34c   : > { %v1263_v54 = vmul.f32 %v2208_v53, %v2202_v48  ;;  %v1264_v55 = vmul.f32 %v2208_v53, %v2204_v50 }
 0x34e   : > { %v1276_v58 = vadd.f32 %v1274_v56, %v1263_v54  ;;  %v1277_v59 = vadd.f32 %v1275_v57, %v1264_v55 }
 0x350   : > { %v1278_v61 = vpack.c.bf16 %v1277_v59, %v1276_v58 }
 0x352   : > { %1972 = vmatmul.mubr.msk.bf16.vlgmr.msra.gmra.mxu1 %vm1280_vm2, %v1278_v61 }
 0x353   : > { %1976 = vmatpush3.bf16.msra.mxu1 %v2181_v60  ;;  %1991 = vmatprep.mubr.msk.bf16.mxu1 %vm2489_vm0, %v2488_v1 }
 0x354   : > { %1977 = vmatprep.subr.bf16.mxu1 %v2488_v1 }
 0x357   : > { %1978 = vmatpush3.bf16.msra.mxu1 %v2182_v62 }
 0x358   : > { %1979 = vmatprep.subr.bf16.mxu1 %v2488_v1 }
 0x35b   : > { %1980 = vmatpush3.bf16.msra.mxu1 %v2183_v63 }
 0x35c   : > { %1981 = vmatprep.subr.bf16.mxu1 %v2488_v1 }
 0x35f   : > { %1982 = vmatpush3.bf16.msra.mxu1 %v2184_v0 }
 0x360   : > { %1983 = vmatprep.subr.bf16.mxu1 %v2488_v1 }
 0x363   : > { %1984 = vmatpush3.bf16.msra.mxu1 %v2185_v2 }
 0x364   : > { %1985 = vmatprep.subr.bf16.mxu1 %v2488_v1 }
 0x367   : > { %1986 = vmatpush3.bf16.msra.mxu1 %v2186_v3 }
 0x368   : > { %1987 = vmatprep.subr.bf16.mxu1 %v2488_v1 }
 0x36b   : > { %1988 = vmatpush3.bf16.msra.mxu1 %v2187_v4 }
 0x36c   : > { %1989 = vmatprep.subr.bf16.mxu1 %v2488_v1  ;;  %v1808_v1 = vld [vmem:[%s2997_s11] ss:$0 sm:$0xff] }
 0x36f   : > { %1990 = vmatpush3.bf16.msra.mxu1 %v2188_v5 }
 0x412   : > { %v1322_v19 = vpop.f32.mrf.mxu1 }
 0x413   : > { %v1329_v24 = vmul.f32 %v1322_v19, %v1129_v21 }
 0x414   : > { %v1973_v20 = vpop.f32.mrf.mxu1 }
 0x416   : > { %v1325_v23 = vpop.f32.mrf.mxu1 }
 0x417   : > { %v1330_v25 = vmul.f32 %v1325_v23, %v1132_v22 }
 0x418   : > { %v1974_v26 = vpop.f32.mrf.mxu1 }
 0x419   : > { %v1331_v27 = vadd.f32 %v1330_v25, %v1329_v24 }
 0x41b   : > { %v1332_v28 = vmul.f32 0.5, %v1331_v27 }
 0x41d   : > { %v1333_v29 = vpack.c.bf16 %v1332_v28, %v1332_v28 }
 0x41f   : > { %1992 = vmatmul.mubr.bf16.vlgmr.msra.gmra.mxu1 %v1333_v29 }
 0x4df   : > { %v1439_v6 = vpop.f32.mrf.mxu1 }
 0x4e0   : > { %v1440_v9 = vadd.f32 %v1808_v1, %v1439_v6 }
 0x4e1   : > { %v1993_v31 = vpop.f32.mrf.mxu1 }
 0x4e2   : > { %v1445_v11 = vpack.c.bf16 %v1440_v9, %v1440_v9 }
 0x4e3   : > { %v1442_v32 = vpop.f32.mrf.mxu1 }
 0x4e4   : > { %2012 = vmatmul.mubr.bf16.vlgmr.msra.gmra.mxu0 %v1445_v11 }
 0x4e5   : > { %v1994_v17 = vpop.f32.mrf.mxu1 }
 0x5a4   : > { %v1551_v34 = vpop.f32.mrf.mxu0 }
 0x5a5   : > { %v1552_v35 = vadd.f32 %v1817_v33, %v1551_v34 }
 0x5a6   : > { %v2013_v36 = vpop.f32.mrf.mxu0 }
 0x5a7   : > { %v1557_v38 = vadd.f32 %v1552_v35, %v1440_v9 }
 0x5a8   : > { %v1554_v39 = vpop.f32.mrf.mxu0 }
 0x5a9   : > { %v1565_v40 = vmul.f32 %v1826_v37, %v1557_v38 }
 0x5aa   : > { %v2014_v41 = vpop.f32.mrf.mxu0 }
 0x5ab   : > { %1566 = vadd.xlane.f32.xlu0 %v1565_v40 }
 0x634   : > { %v1567_v43 = vpop.xlane.xlu0 %1566 }
 0x635   : > { %v1575_v44 = vadd.f32 %v1827_v42, %v1567_v43 }
 0x637   : > { %1578 = vperm.xlu0 %2124, %v1575_v44  }
 0x6b2   : > { %v1579_v45 = vpop.permute.xlu0 %1578 }
 0x6b3   : > { %1581 = vst [vmem:[%s645_s29] sm:$0xff] %v1579_v45 }
 0x6b4   : > { %2408 = shalt.err (!%p2405_p8)
}
 0x6b5   : > { %s2409_s6 = scalar_lea.hbm %s1594_s25, 128  ;;  %s2413_s17 = scalar_lea.hbm %s3053_s18, 256 }
 0x6b6   : > { %p2410_p7 = scmp.ne.s32.totalorder %s1594_s25, %s2409_s6  ;;  %p2414_p2 = scmp.lt.s32.totalorder %s1594_s25, %s3053_s18 }
 0x6b7   : > { %p2415_p11 = scmp.lt.s32.totalorder %s2413_s17, %s2409_s6 }
 0x6b8   : > { %p2411_p12 = pnand %p2410_p7, %p3054_p0 }
 0x6b9   : > { %p2416_p10 = por %p2415_p11, %p2414_p2 }
 0x6ba   : > { %p2412_p6 = pneg %p2411_p12 }
 0x6bc   : > { %p2417_p13 = pnand %p2416_p10, %p2412_p6 }
 0x6be   : > { %2420 = shalt.err (!%p2417_p13)
}
 0x6bf   : > { %2039 = dma.vmem_to_hbm [thread:$0]  (%p3054_p0), %s2946_s19, 128, %s1594_s25, %s1583_s30  }
 0x6c0 PF: > { %s3055_s29 = sld [smem:[#allocation22_spill]]  ;;  %p3058_p9 = scmp.ge.s32.totalorder %s2475_s26, 2 }
 0x6c1   : > { %s3056_s22 = sld [smem:[#allocation27_spill]] }
 0x6c6   : > { %s1608_s10 = sand.u32 1, %s3055_s29  }
 0x6c7   : > { %p3057_p5 = scmp.ne.s32.totalorder %s3056_s22, 0  ;;  %s1609_s20 = scalar_lea.sflag [#allocation5], %s1608_s10 }
 0x6c9   : > { %p2065_p1 = pnand %p3058_p9, %p3057_p5 }
 0x6cb   : > { %p2066_p3 = pneg %p2065_p1 }
 0x6cd   : > { %2458 = dma.done.wait (%p2066_p3), %s1609_s20, 128  }
 0x6ce   : > { %2460 = vsyncadd (%p2066_p3), %s1609_s20, 4294967168  ;;  %s3059_s26 = sld [smem:[#allocation24_spill]]  ;;  %s3062_s23 = smov %s2467_s24 }
 0x6cf   : > { %s3060_s27 = sld [smem:[#allocation23_spill]] }
 0x6d0   : > { %s3061_s25 = sld [smem:[#allocation25_spill]] }
 0x6d4   : > { %p36_p4 = scmp.ge.s32.totalorder %s3059_s26, 4  }
 0x6d5   : > { %s3063_s24 = smov %s3060_s27 }
 0x6d6   :  { %38 = sbr.rel (!%p36_p4) target bundleno = 17 (0x11), region = 162 }
 0x6db   :  { %1614 = vsyncpa [#allocation4], 1 }
 0x6dc   :  { %1616 = vsyncpa [#allocation4 + $0x1], 1 }
 0x6dd   :  { %1617 = vsyncpa [#allocation7], 1 }
 0x6de   :  { %1619 = vsyncpa [#allocation7 + $0x1], 1 }
 0x6df   :  { %1620 = vsyncpa [#allocation10], 1 }
 0x6e0   :  { %1621 = vsyncpa [#allocation13], 1 }
 0x6e1   :  { %1622 = vsyncpa [#allocation5], 1 }
 0x6e2   :  { %1624 = vsyncpa [#allocation5 + $0x1], 1 }

</bundles_post_ra>
